<compile_context>
chip_gen: v5e
topology: v5e:2x2
jax: 0.10.0
libtpu: 0.0.40
codegen_flags: <defaults>
</compile_context>

<pallas_src>
import functools
from typing import Any, NamedTuple

import jax
import jax.numpy as jnp
import numpy as np
from jax.experimental import pallas as pl
from jax.experimental.pallas import tpu as pltpu


# ---------------------------------------------------------------------------
# Kernel
# ---------------------------------------------------------------------------
def _dequant_tile(qw_ref, scale_ref, *, group_size, compute_dtype):
    """Dequantize one repacked (tk//2, tn) uint8 tile into two (tk//2, tn) weight halves.

    Low nibbles correspond to natural K rows [k0, k0+tk/2), high nibbles to
    [k0+tk/2, k0+tk).  All arithmetic runs in compute_dtype (bf16 on v6e/v7x).
    """
    # TODO(synk): v5e-specific K-chunked f32 dequant (single vst slot); the M-tile slab
    # below already amortizes most of the dequant cost, so this is left as a follow-up.
    qw = qw_ref[...]                                   # (tk//2, tn) uint8
    khalf, tn = qw.shape
    ghalf = khalf // group_size                        # groups per K half-tile

    qwi = qw.astype(jnp.int32)                         # safe nibble-unpack path
    lo = ((qwi & 15) - 8).astype(compute_dtype)
    hi = ((qwi >> 4) - 8).astype(compute_dtype)

    s = scale_ref[...].astype(compute_dtype)           # (tk//gs, tn), shipped in compute_dtype
    s_lo = s[:ghalf][:, None, :]                       # groups of the low-nibble K half
    s_hi = s[ghalf:][:, None, :]                       # groups of the high-nibble K half

    w_lo = (lo.reshape(ghalf, group_size, tn) * s_lo).reshape(khalf, tn)
    w_hi = (hi.reshape(ghalf, group_size, tn) * s_hi).reshape(khalf, tn)
    return w_lo, w_hi


def _quant_linear_kernel(x_ref, qw_ref, scale_ref, bias_ref, o_ref, acc_ref,
                         *scratch, group_size, compute_dtype):
    """One (tm, tn) output tile.  Grid = (n_tiles, m_tiles, k_tiles), K innermost.

    x_ref     : (tm, tk)       activations (natural K order, compute_dtype)
    qw_ref    : (tk//2, tn)    repacked uint8 (low nibble -> first K half of the tile)
    scale_ref : (tk//gs, tn)   per-group scales for this K tile (compute_dtype)
    bias_ref  : (1, tn)        f32
    o_ref     : (tm, tn)
    acc_ref   : (tm, tn)       f32 scratch accumulator (resident across the K axis)
    scratch   : optional (K, tn) compute_dtype slab caching dequantized weights across M
    """
    m_idx = pl.program_id(1)
    k_idx = pl.program_id(2)
    tk = x_ref.shape[1]
    khalf = tk // 2

    @pl.when(k_idx == 0)
    def _():
        acc_ref[...] = jnp.zeros_like(acc_ref)

    if scratch:
        # Slab path: dequantize each (n, k) weight tile exactly once (first M tile) into
        # the persistent VMEM slab; every later M tile reuses it, skipping all dequant
        # VALU work and its temporaries.
        wslab_ref = scratch[0]

        @pl.when(m_idx == 0)
        def _():
            w_lo, w_hi = _dequant_tile(qw_ref, scale_ref,
                                       group_size=group_size, compute_dtype=compute_dtype)
            base_lo = pl.multiple_of(k_idx * tk, khalf)
            base_hi = pl.multiple_of(k_idx * tk + khalf, khalf)
            wslab_ref[pl.ds(base_lo, khalf), :] = w_lo
            wslab_ref[pl.ds(base_hi, khalf), :] = w_hi

        base = pl.multiple_of(k_idx * tk, tk)
        w = wslab_ref[pl.ds(base, tk), :]              # (tk, tn) natural K order
        acc_ref[...] += jnp.dot(x_ref[...], w, preferred_element_type=jnp.float32)
    else:
        # Decode / single-M-tile path: dequantize in vregs and feed the MXU directly
        # (a slab would only add a VMEM round-trip here).
        w_lo, w_hi = _dequant_tile(qw_ref, scale_ref,
                                   group_size=group_size, compute_dtype=compute_dtype)
        x = x_ref[...]
        acc_ref[...] += (
            jnp.dot(x[:, :khalf], w_lo, preferred_element_type=jnp.float32)
            + jnp.dot(x[:, khalf:], w_hi, preferred_element_type=jnp.float32))

    @pl.when(k_idx == pl.num_programs(2) - 1)
    def _():
        o_ref[...] = (acc_ref[...] + bias_ref[...]).astype(o_ref.dtype)


# ---------------------------------------------------------------------------
# Tiling / packing helpers
# ---------------------------------------------------------------------------
def _round_up(v, m):
    return ((v + m - 1) // m) * m


def _pick_tk(k, group_size, cap=1024):
    """Largest K tile <= cap that divides K, is a multiple of 2*group_size and, when the
    K axis is actually tiled, keeps tk/2 lane-aligned (tk % 256 == 0) and the bf16 scale
    block sublane-aligned ((tk // group_size) % 16 == 0).  Falls back to the full K axis
    (blocks then equal the full array dims, so tiling constraints don't apply)."""
    unit = 2 * group_size
    if k % unit != 0:
        # TODO(synk): support K % (2*group_size) != 0 via an uneven tail tile.
        raise ValueError(
            f"quant_linear: need K % (2*group_size) == 0 (got K={k}, gs={group_size})")
    best = None
    t = unit
    while t <= min(k, cap):
        if k % t == 0 and t % 256 == 0 and (t // group_size) % 16 == 0:
            best = t
        t += unit
    return best if best is not None else k


def _pick_tn(n, cap=512):
    """Largest multiple of 128 (preferring >=256 for the 256x256 MXU) that divides N."""
    if n % 128 != 0:
        return n
    best = 128
    t = 256
    while t <= min(n, cap):
        if n % t == 0:
            best = t
        t += 128
    return best


def _pick_tm(m):
    """M tile: multiple of 16 (bf16 sublane packing); grow to 512 for large prefill so
    MXU work per K step dwarfs the fixed per-step dequant/overhead."""
    if m >= 512:
        return 512
    if m > 256:
        return 256
    return max(16, _round_up(m, 16))


def _repack_qweight(qweight, tk):
    """Repack bytes so low/high nibbles map to contiguous K halves within each K tile.

    Weight-only transform (K/2 * N bytes), done ONCE at load time via
    prepare_quant_linear; the layout depends on tk, so the kernel must use the same tk."""
    khalf, n = qweight.shape
    k = khalf * 2
    lo = qweight & jnp.uint8(15)
    hi = qweight >> 4
    # int4 magnitudes (0..15) in natural K-row order: row 2i <- low(q[i]), 2i+1 <- high(q[i]).
    q_full = jnp.stack([lo, hi], axis=1).reshape(k, n)
    q_t = q_full.reshape(k // tk, 2, tk // 2, n)
    return (q_t[:, 0] | (q_t[:, 1] << 4)).reshape(khalf, n)


# ---------------------------------------------------------------------------
# Public API: one-time weight prep + per-call apply
# ---------------------------------------------------------------------------
class QuantLinearParams(NamedTuple):
    qweight_packed: jax.Array     # (K//2, N) uint8, repacked for `tk`
    scale: jax.Array              # (K//group_size, N) in compute_dtype
    bias: jax.Array               # (1, N) float32
    group_size: int
    tk: int                       # K tile the packing was built for
    compute_dtype: Any


def prepare_quant_linear(qweight, scale, bias=None, *, group_size=None,
                         compute_dtype=jnp.bfloat16, tk=None):
    """One-time (load-time) weight-side preprocessing.

    Hoisted out of the forward path: the nibble repack re-streams K/2*N bytes through HBM
    and would dominate decode latency if done per call.  Scales are shipped in
    compute_dtype (bf16 by default) to cut weight-side HBM traffic."""
    khalf, n = qweight.shape
    k = khalf * 2
    g = scale.shape[0]
    if group_size is None:
        group_size = k // g
    assert k % group_size == 0 and g == k // group_size and group_size % 2 == 0
    if tk is None:
        tk = _pick_tk(k, group_size)
    else:
        assert k % tk == 0 and tk % (2 * group_size) == 0
    qw2 = _repack_qweight(qweight.astype(jnp.uint8), tk)
    scale_c = scale.astype(compute_dtype)
    if bias is None:
        bias = jnp.zeros((n,), jnp.float32)
    bias2 = bias.astype(jnp.float32).reshape(1, n)
    return QuantLinearParams(qw2, scale_c, bias2, group_size, tk, compute_dtype)


def quant_linear_apply(params: QuantLinearParams, x, *, tm=None):
    """out = x @ unpack_int4(qweight, scale) + bias  (feature-last, like nn.Linear)."""
    *lead, k = x.shape
    khalf, n = params.qweight_packed.shape
    assert khalf * 2 == k, "qweight must be (in_features // 2, out_features)"
    group_size = params.group_size
    compute_dtype = params.compute_dtype
    tk = params.tk
    out_dtype = x.dtype

    x2 = x.reshape(-1, k)
    m = x2.shape[0]
    if x2.dtype != jnp.dtype(compute_dtype):
        # Pre-cast activations once in the wrapper: halves the x HBM traffic re-read for
        # every N tile and removes the per-step in-kernel cast.
        x2 = x2.astype(compute_dtype)

    tn = _pick_tn(n)
    tm = _pick_tm(m) if tm is None else tm
    mp = _round_up(m, tm)
    if mp != m:
        x2 = jnp.pad(x2, ((0, mp - m), (0, 0)))

    grid_n, grid_m, grid_k = n // tn, mp // tm, k // tk

    # Cache dequantized weights of the current N column block across M tiles whenever
    # there is more than one M tile; skip for decode (single M tile) and cap the slab so
    # the whole working set stays inside v7x's 64 MiB VMEM.
    slab_bytes = k * tn * jnp.dtype(compute_dtype).itemsize
    use_slab = grid_m > 1 and slab_bytes <= 20 * 2**20

    # Decode-shaped calls are pure weight DMA; 3-deep buffering on the weight-side inputs
    # hides DMA issue jitter that 2 buffers can't cover at tiny per-step compute.
    weight_buffers = 3 if (grid_m == 1 and grid_k >= 3) else 2
    weight_spec_kwargs = {}
    if weight_buffers == 3:
        weight_spec_kwargs = dict(pipeline_mode=pl.Buffered(3))

    kernel = functools.partial(_quant_linear_kernel,
                               group_size=group_size, compute_dtype=compute_dtype)

    scratch_shapes = [pltpu.VMEM((tm, tn), jnp.float32)]
    if use_slab:
        scratch_shapes.append(pltpu.VMEM((k, tn), compute_dtype))

    x_item = jnp.dtype(compute_dtype).itemsize
    sc_item = params.scale.dtype.itemsize
    out_item = jnp.dtype(out_dtype).itemsize

    # Cost estimate: x is re-read for every N tile; packed weights/scales for every M tile.
    flops = 2 * mp * n * k
    bytes_accessed = (grid_n * mp * k * x_item
                      + grid_m * (khalf * n + (k // group_size) * n * sc_item)
                      + n * 4
                      + mp * n * out_item)

    # VMEM budget from actual usage (+ headroom) instead of a blanket request; v7x has
    # only 64 MiB of VMEM per TensorCore.
    vmem_est = (2 * tm * tk * x_item
                + weight_buffers * khalf // (k // tk) * 0  # (kept explicit below)
                + weight_buffers * (tk // 2) * tn
                + weight_buffers * (tk // group_size) * tn * sc_item
                + 2 * tn * 4
                + 2 * tm * tn * out_item
                + tm * tn * 4
                + (slab_bytes if use_slab else 0))
    vmem_limit = min(56 * 2**20, int(1.5 * vmem_est) + 8 * 2**20)

    out = pl.pallas_call(
        kernel,
        out_shape=jax.ShapeDtypeStruct((mp, n), out_dtype),
        grid_spec=pltpu.PrefetchScalarGridSpec(
            num_scalar_prefetch=0,
            grid=(grid_n, grid_m, grid_k),
            in_specs=[
                pl.BlockSpec((tm, tk), lambda j, i, kk: (i, kk)),                   # x
                pl.BlockSpec((tk // 2, tn), lambda j, i, kk: (kk, j),
                             **weight_spec_kwargs),                                  # qweight
                pl.BlockSpec((tk // group_size, tn), lambda j, i, kk: (kk, j),
                             **weight_spec_kwargs),                                  # scale
                pl.BlockSpec((1, tn), lambda j, i, kk: (0, j)),                      # bias
            ],
            out_specs=pl.BlockSpec((tm, tn), lambda j, i, kk: (i, j)),
            scratch_shapes=scratch_shapes,
        ),
        compiler_params=pltpu.CompilerParams(
            # N tiles are independent (megacore-shardable); M carries the slab, K the
            # accumulator -> both must run in order on one core.
            dimension_semantics=("parallel", "arbitrary", "arbitrary"),
            vmem_limit_bytes=vmem_limit,
        ),
        cost_estimate=pl.CostEstimate(
            flops=flops, bytes_accessed=bytes_accessed, transcendentals=0),
    )(x2, params.qweight_packed, params.scale, params.bias)

    return out[:m].reshape(*lead, n)


def quant_linear(x, qweight, scale, bias=None, *, group_size=None,
                 compute_dtype=jnp.bfloat16, tm=None, tk=None):
    """Convenience one-shot wrapper (packs the weights per call).  In a real model call
    prepare_quant_linear once at load time and quant_linear_apply per forward."""
    params = prepare_quant_linear(qweight, scale, bias, group_size=group_size,
                                  compute_dtype=compute_dtype, tk=tk)
    return quant_linear_apply(params, x, tm=tm)


# ---------------------------------------------------------------------------
# Reference (mirrors the PyTorch unpack_int4, evaluated exactly in numpy float64)
# ---------------------------------------------------------------------------
def unpack_int4_ref(qw, scale):
    khalf, n = qw.shape
    column_num = khalf * 2
    g = scale.shape[0]
    gs = column_num // g
    q = np.asarray(qw).astype(np.int32)
    low = (q & 15) - 8
    high = ((q >> 4) & 15) - 8
    w = np.stack([low, high], axis=1).reshape(column_num, n).astype(np.float64)
    w = (w.reshape(g, gs, n) * np.asarray(scale, np.float64)[:, None, :]).reshape(column_num, n)
    return w


if __name__ == "__main__":
    def run_case(batch, seq, in_features, out_features, group_size,
                 compute_dtype, tm, tk, rtol, atol, seed):
        key = jax.random.PRNGKey(seed)
        kx, kq, ks, kb = jax.random.split(key, 4)
        x = jax.random.normal(kx, (batch, seq, in_features), dtype=jnp.float32)
        qweight = jax.random.randint(
            kq, (in_features // 2, out_features), 0, 256, dtype=jnp.int32
        ).astype(jnp.uint8)
        scale = (jax.random.uniform(ks, (in_features // group_size, out_features),
                                    dtype=jnp.float32) * 0.1 + 0.01)
        bias = jax.random.normal(kb, (out_features,), dtype=jnp.float32)

        w_ref = unpack_int4_ref(qweight, scale)
        ref = (np.asarray(x, np.float64).reshape(-1, in_features) @ w_ref
               + np.asarray(bias, np.float64)).reshape(batch, seq, out_features)

        params = prepare_quant_linear(qweight, scale, bias, group_size=group_size,
                                      compute_dtype=compute_dtype, tk=tk)
        out = jax.block_until_ready(quant_linear_apply(params, x, tm=tm))
        np.testing.assert_allclose(np.asarray(out, np.float64), ref, rtol=rtol, atol=atol)

    # 1) Module-sized small case (in=64, out=128, gs=32), default bf16 path, single M tile
    #    (decode-style, no slab), exercises M padding (m=10 -> mp=16).
    run_case(batch=2, seq=5, in_features=64, out_features=128, group_size=32,
             compute_dtype=jnp.bfloat16, tm=None, tk=None, rtol=5e-2, atol=1e-1, seed=0)

    # 2) Same shapes, f32 dequant/compute path (v5e-style exactness), forced multi-M-tile
    #    (tm=16 -> 3 M tiles) so the dequantized-weight slab path is exercised.
    run_case(batch=2, seq=24, in_features=64, out_features=128, group_size=32,
             compute_dtype=jnp.float32, tm=16, tk=None, rtol=2e-2, atol=5e-2, seed=1)

    # 3) Tiled-K case: K=1024 with tk=512 (2 K steps) + 3 M tiles -> slab with dynamic K
    #    offsets and f32 accumulation across K, default bf16 compute.
    run_case(batch=2, seq=24, in_features=1024, out_features=256, group_size=32,
             compute_dtype=jnp.bfloat16, tm=16, tk=512, rtol=1e-1, atol=2.5e-1, seed=2)

    print("KERNEL_OK")
</pallas_src>

<mosaic_0001>
module attributes {stable_mosaic.version = 11 : i64} {
  func.func @_quant_linear_kernel(%arg0: i32, %arg1: i32, %arg2: i32, %arg3: memref<16x64xbf16, #tpu.memory_space<vmem>>, %arg4: memref<32x128xi8, #tpu.memory_space<vmem>>, %arg5: memref<2x128xbf16, #tpu.memory_space<vmem>>, %arg6: memref<1x128xf32, #tpu.memory_space<vmem>>, %arg7: memref<16x128xf32, #tpu.memory_space<vmem>>, %arg8: memref<16x128xf32, #tpu.memory_space<vmem>>) attributes {dimension_semantics = [#tpu.dimension_semantics<parallel>, #tpu.dimension_semantics<arbitrary>, #tpu.dimension_semantics<arbitrary>], iteration_bounds = array<i64: 1, 1, 1>, scalar_prefetch = 0 : i64, scratch_operands = 1 : i64, tpu.core_type = #tpu.core_type<tc>, window_params = [{transform_indices = @transform_0, window_bounds = array<i64: 16, 64>}, {transform_indices = @transform_1, window_bounds = array<i64: 32, 128>}, {transform_indices = @transform_2, window_bounds = array<i64: 2, 128>}, {transform_indices = @transform_3, window_bounds = array<i64: 1, 128>}, {transform_indices = @transform_4, window_bounds = array<i64: 16, 128>}]} {
    %c0_i32 = arith.constant 0 : i32
    %0 = arith.cmpi eq, %arg2, %c0_i32 : i32
    %1 = arith.extui %0 : i1 to i32
    %c0_i32_0 = arith.constant 0 : i32
    %2 = arith.cmpi ne, %1, %c0_i32_0 : i32
    scf.if %2 {
      %cst_14 = arith.constant 0.000000e+00 : f32
      %40 = vector.broadcast %cst_14 : f32 to vector<16x128xf32>
      %c0_15 = arith.constant 0 : index
      %c0_16 = arith.constant 0 : index
      %41 = vector.load %arg8[%c0_15, %c0_16] : memref<16x128xf32, #tpu.memory_space<vmem>>, vector<16x128xf32>
      tpu.vector_store %arg8[%c0_15, %c0_16], %40 {strides = array<i32>} : memref<16x128xf32, #tpu.memory_space<vmem>>, vector<16x128xf32>,
    } else {
    }
    %c0 = arith.constant 0 : index
    %c0_1 = arith.constant 0 : index
    %3 = vector.load %arg4[%c0, %c0_1] : memref<32x128xi8, #tpu.memory_space<vmem>>, vector<32x128xi8>
    %4 = arith.extui %3 : vector<32x128xi8> to vector<32x128xi32>
    %c15_i32 = arith.constant 15 : i32
    %5 = vector.broadcast %c15_i32 : i32 to vector<32x128xi32>
    %6 = arith.andi %4, %5 : vector<32x128xi32>
    %c8_i32 = arith.constant 8 : i32
    %7 = vector.broadcast %c8_i32 : i32 to vector<32x128xi32>
    %8 = arith.subi %6, %7 : vector<32x128xi32>
    %9 = arith.sitofp %8 : vector<32x128xi32> to vector<32x128xbf16>
    %c4_i32 = arith.constant 4 : i32
    %10 = vector.broadcast %c4_i32 : i32 to vector<32x128xi32>
    %11 = arith.shrsi %4, %10 : vector<32x128xi32>
    %c8_i32_2 = arith.constant 8 : i32
    %12 = vector.broadcast %c8_i32_2 : i32 to vector<32x128xi32>
    %13 = arith.subi %11, %12 : vector<32x128xi32>
    %14 = arith.sitofp %13 : vector<32x128xi32> to vector<32x128xbf16>
    %c0_3 = arith.constant 0 : index
    %c0_4 = arith.constant 0 : index
    %15 = vector.load %arg5[%c0_3, %c0_4] : memref<2x128xbf16, #tpu.memory_space<vmem>>, vector<2x128xbf16>
    %16 = vector.extract_strided_slice %15 {offsets = [0, 0], sizes = [1, 128], strides = [1, 1]} : vector<2x128xbf16> to vector<1x128xbf16>
    %17 = vector.shape_cast %16 : vector<1x128xbf16> to vector<1x1x128xbf16>
    %18 = vector.extract_strided_slice %15 {offsets = [1, 0], sizes = [1, 128], strides = [1, 1]} : vector<2x128xbf16> to vector<1x128xbf16>
    %19 = vector.shape_cast %18 : vector<1x128xbf16> to vector<1x1x128xbf16>
    %20 = vector.shape_cast %9 : vector<32x128xbf16> to vector<1x32x128xbf16>
    %21 = vector.broadcast %17 : vector<1x1x128xbf16> to vector<1x32x128xbf16>
    %22 = arith.mulf %20, %21 : vector<1x32x128xbf16>
    %23 = vector.shape_cast %22 : vector<1x32x128xbf16> to vector<32x128xbf16>
    %24 = vector.shape_cast %14 : vector<32x128xbf16> to vector<1x32x128xbf16>
    %25 = vector.broadcast %19 : vector<1x1x128xbf16> to vector<1x32x128xbf16>
    %26 = arith.mulf %24, %25 : vector<1x32x128xbf16>
    %27 = vector.shape_cast %26 : vector<1x32x128xbf16> to vector<32x128xbf16>
    %c0_5 = arith.constant 0 : index
    %c0_6 = arith.constant 0 : index
    %28 = vector.load %arg3[%c0_5, %c0_6] : memref<16x64xbf16, #tpu.memory_space<vmem>>, vector<16x64xbf16>
    %c0_7 = arith.constant 0 : index
    %c0_8 = arith.constant 0 : index
    %29 = vector.load %arg8[%c0_7, %c0_8] : memref<16x128xf32, #tpu.memory_space<vmem>>, vector<16x128xf32>
    %30 = vector.extract_strided_slice %28 {offsets = [0, 0], sizes = [16, 32], strides = [1, 1]} : vector<16x64xbf16> to vector<16x32xbf16>
    %cst = arith.constant dense<0.000000e+00> : vector<16x128xf32>
    %31 = tpu.matmul %30, %23, %cst {dimension_numbers = #tpu.dot_dimension_numbers<[1], [0], [0], [1], [0, 0, 1, 1], [], []>} : vector<16x32xbf16>, vector<32x128xbf16>, vector<16x128xf32> -> vector<16x128xf32>
    %32 = vector.extract_strided_slice %28 {offsets = [0, 32], sizes = [16, 32], strides = [1, 1]} : vector<16x64xbf16> to vector<16x32xbf16>
    %cst_9 = arith.constant dense<0.000000e+00> : vector<16x128xf32>
    %33 = tpu.matmul %32, %27, %cst_9 {dimension_numbers = #tpu.dot_dimension_numbers<[1], [0], [0], [1], [0, 0, 1, 1], [], []>} : vector<16x32xbf16>, vector<32x128xbf16>, vector<16x128xf32> -> vector<16x128xf32>
    %34 = arith.addf %31, %33 : vector<16x128xf32>
    %35 = arith.addf %29, %34 : vector<16x128xf32>
    %c0_10 = arith.constant 0 : index
    %c0_11 = arith.constant 0 : index
    %36 = vector.load %arg8[%c0_10, %c0_11] : memref<16x128xf32, #tpu.memory_space<vmem>>, vector<16x128xf32>
    tpu.vector_store %arg8[%c0_10, %c0_11], %35 {strides = array<i32>} : memref<16x128xf32, #tpu.memory_space<vmem>>, vector<16x128xf32>,
    %c0_i32_12 = arith.constant 0 : i32
    %37 = arith.cmpi eq, %arg2, %c0_i32_12 : i32
    %38 = arith.extui %37 : i1 to i32
    %c0_i32_13 = arith.constant 0 : i32
    %39 = arith.cmpi ne, %38, %c0_i32_13 : i32
    scf.if %39 {
      %c0_14 = arith.constant 0 : index
      %c0_15 = arith.constant 0 : index
      %40 = vector.load %arg8[%c0_14, %c0_15] : memref<16x128xf32, #tpu.memory_space<vmem>>, vector<16x128xf32>
      %c0_16 = arith.constant 0 : index
      %c0_17 = arith.constant 0 : index
      %41 = vector.load %arg6[%c0_16, %c0_17] : memref<1x128xf32, #tpu.memory_space<vmem>>, vector<1x128xf32>
      %42 = vector.broadcast %41 : vector<1x128xf32> to vector<16x128xf32>
      %43 = arith.addf %40, %42 : vector<16x128xf32>
      %c0_18 = arith.constant 0 : index
      %c0_19 = arith.constant 0 : index
      %44 = vector.load %arg7[%c0_18, %c0_19] : memref<16x128xf32, #tpu.memory_space<vmem>>, vector<16x128xf32>
      tpu.vector_store %arg7[%c0_18, %c0_19], %43 {strides = array<i32>} : memref<16x128xf32, #tpu.memory_space<vmem>>, vector<16x128xf32>,
    } else {
    }
    return
  }
  func.func @transform_0(%arg0: i32, %arg1: i32, %arg2: i32) -> (i32, i32) {
    %c0_i32 = arith.constant 0 : i32
    return %arg1, %arg2 : i32, i32
  }
  func.func @transform_1(%arg0: i32, %arg1: i32, %arg2: i32) -> (i32, i32) {
    %c0_i32 = arith.constant 0 : i32
    return %arg2, %arg0 : i32, i32
  }
  func.func @transform_2(%arg0: i32, %arg1: i32, %arg2: i32) -> (i32, i32) {
    %c0_i32 = arith.constant 0 : i32
    return %arg2, %arg0 : i32, i32
  }
  func.func @transform_3(%arg0: i32, %arg1: i32, %arg2: i32) -> (i32, i32) {
    %c0_i32 = arith.constant 0 : i32
    %c0_i32_0 = arith.constant 0 : i32
    return %c0_i32, %arg0 : i32, i32
  }
  func.func @transform_4(%arg0: i32, %arg1: i32, %arg2: i32) -> (i32, i32) {
    %c0_i32 = arith.constant 0 : i32
    return %arg1, %arg0 : i32, i32
  }
}

</mosaic_0001>

<bundles_post_ra>
// kernel: tpu_custom_call.1
= control target key start
LH: loop header
LB: loop body
LE: loop exit
PB: predicated region body
PF: predicated region fallthrough
CT: control target
= control target key end

     0   :  { %9 = vsyncpa [#allocation4], 0  ;;  %s392_s0 = inlined_call_operand.hbm [shape: bf16[16,64], index: 0, kind: input, shape index: {}]   ;;  %s393_s1 = inlined_call_operand.hbm [shape: u8[32,128], index: 1, kind: input, shape index: {}]   ;;  %s394_s2 = inlined_call_operand.vmem [shape: bf16[2,128], index: 2, kind: input, shape index: {}]   ;;  %s395_s3 = inlined_call_operand.vmem [shape: f32[1,128], index: 3, kind: input, shape index: {}]   ;;  %s396_s4 = inlined_call_operand.hbm [shape: f32[16,128], index: 4, kind: output, shape index: {}]  }
   0x1   :  { %10 = vsyncpa [#allocation7], 0 }
   0x2   :  { %11 = vsyncpa [#allocation5], 0  ;;  %s16_s17 = sshll.u32 %s392_s0, 4  ;;  %s340_s18 = smov [#allocation3]   ;;  %s17_s17 = int_to_ptr.hbm [resolvable:$true] %s16_s17 }
   0x3   :  { %s18_s19 = sshll.u32 %s340_s18, 4  ;;  %s30_s22 = sshll.u32 %s393_s1, 4  ;;  %s19_s19 = int_to_ptr.vmem [resolvable:$true] %s18_s19  ;;  %s31_s22 = int_to_ptr.hbm [resolvable:$true] %s30_s22 }
   0x4   :  { %s341_s23 = smov 64   ;;  %s342_s24 = smov 4  }
   0x5   :  { %24 = dma.hbm_to_vmem [thread:$0]  %s17_s17, 128, %s19_s19, [#allocation4], %s341_s23, %s341_s23, %s342_s24  }
   0x6   :  { %s343_s25 = smov [#allocation6]  }
   0x7   :  { %s32_s26 = sshll.u32 %s343_s25, 4  ;;  %s33_s26 = int_to_ptr.vmem [resolvable:$true] %s32_s26 }
   0x8   :  { %35 = dma.hbm_to_vmem [thread:$0]  %s31_s22, 128, %s33_s26, [#allocation7]  }
   0x9   :  { %334 = dma.done.wait [#allocation4], 128  }
   0xa   :  { %335 = vsyncadd [#allocation4], 4294967168 }
   0xb   :  { %336 = dma.done.wait [#allocation7], 128  }
   0xc   :  { %337 = vsyncadd [#allocation7], 4294967168  ;;  %v379_v0 = vld [vmem:[#allocation3] sm:$0xff]  ;;  %v55_v1 = vld [vmem:[#allocation6] sm:$0xff]  ;;  %s344_s1 = smov 96   ;;  %vm154_vm0 = vcmask 261120  }
   0xd   :  { %v96_v2 = vld [vmem:[%s394_s2] sm:$0x1]  ;;  %v58_v3 = vunpack.c.2.s8 %v55_v1  ;;  %v59_v4 = vunpack.c.3.s8 %v55_v1  ;;  %v56_v6 = vunpack.c.0.s8 %v55_v1  ;;  %140 = vrot.lane.b32.xlu0 %v379_v0, %s344_s1  ;;  %v57_v7 = vunpack.c.1.s8 %v55_v1  ;;  %s345_s29 = smov [#allocation8]   ;;  %s224_s7 = sshll.u32 %s396_s4, 4  ;;  %s225_s7 = int_to_ptr.hbm [resolvable:$true] %s224_s7 }
   0xe   :  { %v98_v5 = vpack.i.b16 %v96_v2, %v96_v2  ;;  %v114_v8 = vshrl.u32 %v96_v2, 16  ;;  %s222_s30 = sshll.u32 %s345_s29, 4  ;;  %s346_s8 = smov 128   ;;  %s223_s30 = int_to_ptr.vmem [resolvable:$true] %s222_s30 }
   0xf   :  { %v62_v9 = vand.u32 255, %v58_v3  ;;  %v63_v10 = vand.u32 255, %v59_v4  ;;  %v60_v12 = vand.u32 255, %v56_v6  ;;  %v61_v13 = vand.u32 255, %v57_v7  ;;  %s347_s9 = smov 8  }
  0x10   :  { %v100_v11 = vperm.slane %v98_v5, 0  ;;  %v115_v14 = vpack.i.b16 %v114_v8, %v114_v8 }
  0x11   :  { %v66_v15 = vand.u32 15, %v62_v9  ;;  %v67_v16 = vand.u32 15, %v63_v10  ;;  %v64_v18 = vand.u32 15, %v60_v12  ;;  %v65_v19 = vand.u32 15, %v61_v13 }
  0x12   :  { %v105_v17 = vunpack.c.l.bf16 %v100_v11  ;;  %v82_v20 = vshra.s32 %v62_v9, 4  ;;  %v83_v21 = vshra.s32 %v63_v10, 4  ;;  %v117_v22 = vperm.slane %v115_v14, 0 }
  0x13   :  { %v240_v23 = vadd.s32 4294967288, %v66_v15  ;;  %v241_v24 = vadd.s32 4294967288, %v67_v16  ;;  %v238_v25 = vadd.s32 4294967288, %v64_v18  ;;  %v80_v26 = vshra.s32 %v60_v12, 4 }
  0x14   :  { %v239_v27 = vadd.s32 4294967288, %v65_v19  ;;  %v244_v28 = vadd.s32 4294967288, %v82_v20  ;;  %v245_v29 = vadd.s32 4294967288, %v83_v21  ;;  %v122_v30 = vunpack.c.l.bf16 %v117_v22 }
  0x15   :  { %v74_v31 = vcvt.s32.f32 %v240_v23  ;;  %v75_v32 = vcvt.s32.f32 %v241_v24  ;;  %v72_v33 = vcvt.s32.f32 %v238_v25  ;;  %v81_v34 = vshra.s32 %v61_v13, 4  ;;  %v261_v25 = vld [vmem:[%s395_s3] ss:$0 sm:$0xff] }
  0x16   :  { %v73_v35 = vcvt.s32.f32 %v239_v27  ;;  %v90_v36 = vcvt.s32.f32 %v244_v28  ;;  %v91_v37 = vcvt.s32.f32 %v245_v29  ;;  %v242_v38 = vadd.s32 4294967288, %v80_v26 }
  0x17   :  { %v78_v39 = vpack.c.bf16 %v74_v31, %v74_v31  ;;  %v79_v40 = vpack.c.bf16 %v75_v32, %v75_v32  ;;  %v76_v41 = vpack.c.bf16 %v72_v33, %v72_v33  ;;  %v243_v42 = vadd.s32 4294967288, %v81_v34 }
  0x18   :  { %v77_v43 = vpack.c.bf16 %v73_v35, %v73_v35  ;;  %v94_v44 = vpack.c.bf16 %v90_v36, %v90_v36  ;;  %v95_v45 = vpack.c.bf16 %v91_v37, %v91_v37  ;;  %v88_v46 = vcvt.s32.f32 %v242_v38 }
  0x19   :  { %v103_v47 = vunpack.c.l.bf16 %v78_v39  ;;  %v104_v48 = vunpack.c.l.bf16 %v79_v40  ;;  %v101_v49 = vunpack.c.l.bf16 %v76_v41  ;;  %v89_v50 = vcvt.s32.f32 %v243_v42 }
  0x1a   :  { %v102_v51 = vunpack.c.l.bf16 %v77_v43  ;;  %v120_v52 = vunpack.c.l.bf16 %v94_v44  ;;  %v121_v53 = vunpack.c.l.bf16 %v95_v45  ;;  %v92_v54 = vpack.c.bf16 %v88_v46, %v88_v46 }
  0x1b   :  { %v108_v55 = vmul.f32 %v105_v17, %v103_v47  ;;  %v109_v56 = vmul.f32 %v105_v17, %v104_v48  ;;  %v106_v57 = vmul.f32 %v105_v17, %v101_v49  ;;  %v93_v58 = vpack.c.bf16 %v89_v50, %v89_v50 }
  0x1c   :  { %v107_v59 = vmul.f32 %v105_v17, %v102_v51  ;;  %v125_v60 = vmul.f32 %v122_v30, %v120_v52  ;;  %v126_v61 = vmul.f32 %v122_v30, %v121_v53  ;;  %v118_v62 = vunpack.c.l.bf16 %v92_v54 }
  0x1d   :  { %v112_v63 = vpack.c.bf16 %v108_v55, %v108_v55  ;;  %v113_v1 = vpack.c.bf16 %v109_v56, %v109_v56  ;;  %v110_v2 = vpack.c.bf16 %v106_v57, %v106_v57  ;;  %v119_v3 = vunpack.c.l.bf16 %v93_v58 }
  0x1e   :  { %v111_v4 = vpack.c.bf16 %v107_v59, %v107_v59  ;;  %v129_v5 = vpack.c.bf16 %v125_v60, %v125_v60  ;;  %v130_v6 = vpack.c.bf16 %v126_v61, %v126_v61  ;;  %v123_v7 = vmul.f32 %v122_v30, %v118_v62 }
  0x1f   :  { %v178_v8 = vunpack.c.l.b16 %v112_v63  ;;  %v179_v9 = vunpack.c.l.b16 %v113_v1  ;;  %v176_v10 = vunpack.c.l.b16 %v110_v2  ;;  %v124_v11 = vmul.f32 %v122_v30, %v119_v3 }
  0x20   :  { %v177_v12 = vunpack.c.l.b16 %v111_v4  ;;  %v148_v13 = vunpack.c.l.b16 %v129_v5  ;;  %v149_v14 = vunpack.c.l.b16 %v130_v6  ;;  %v127_v15 = vpack.c.bf16 %v123_v7, %v123_v7 }
  0x21   :  { %v181_v16 = vpack.c.b16 %v179_v9, %v178_v8  ;;  %v128_v17 = vpack.c.bf16 %v124_v11, %v124_v11 }
  0x22   :  { %v151_v18 = vpack.c.b16 %v149_v14, %v148_v13  ;;  %v146_v19 = vunpack.c.l.b16 %v127_v15  ;;  %v180_v20 = vpack.c.b16 %v177_v12, %v176_v10 }
  0x23   :  { %193 = vmatpush.bf16.msra.mxu1 %v181_v16  ;;  %v147_v21 = vunpack.c.l.b16 %v128_v17 }
  0x24   :  { %164 = vmatpush.bf16.msra.mxu0 %v151_v18 }
  0x25   :  { %v150_v22 = vpack.c.b16 %v147_v21, %v146_v19 }
  0x27   :  { %194 = vmatpush.bf16.msra.mxu1 %v180_v20 }
  0x28   :  { %165 = vmatpush.bf16.msra.mxu0 %v150_v22 }
  0x2a   :  { %251 = vmatmul.msk.bf16.vlgmr.msra.gmra.mxu1 %vm154_vm0, %v379_v0 }
  0x7f   :  { %v141_v23 = vpop.permute.xlu0 %140 }
  0x80   :  { %250 = vmatmul.msk.bf16.vlgmr.msra.gmra.mxu0 %vm154_vm0, %v141_v23 }
  0xa7   :  { %v196_v24 = vpop.f32.mrf.mxu1 }
  0xaf   :  { %v198_v29 = vpop.f32.mrf.mxu1 }
  0xfd   :  { %v167_v26 = vpop.f32.mrf.mxu0 }
  0xfe   :  { %v197_v27 = vadd.f32 %v196_v24, %v167_v26 }
 0x100   :  { %v214_v28 = vadd.f32 %v261_v25, %v197_v27 }
 0x102   :  { %216 = vst [vmem:[#allocation8] sm:$0xff] %v214_v28 }
 0x105   :  { %v169_v30 = vpop.f32.mrf.mxu0 }
 0x106   :  { %v199_v0 = vadd.f32 %v198_v29, %v169_v30 }
 0x108   :  { %v215_v31 = vadd.f32 %v261_v25, %v199_v0 }
 0x10a   :  { %217 = vst [vmem:[#allocation8 + $0x8] sm:$0xff] %v215_v31 }
 0x10b   :  { %230 = dma.vmem_to_hbm [thread:$0]  %s223_s30, 256, %s225_s7, [#allocation5], %s346_s8, %s346_s8, %s347_s9  }
 0x10c   :  { %338 = dma.done.wait [#allocation5], 256  }
 0x10d   :  { %339 = vsyncadd [#allocation5], 4294967040 }
 0x10e   :  { %235 = vsyncpa [#allocation4], 1 }
 0x10f   :  { %236 = vsyncpa [#allocation7], 1 }
 0x110   :  { %237 = vsyncpa [#allocation5], 1 }

</bundles_post_ra>
